<compile_context>
chip_gen: v7x
topology: tpu7x:2x2x1
jax: 0.10.0
libtpu: 0.0.40
codegen_flags: <defaults>
</compile_context>

<pallas_src>
import jax
import jax.numpy as jnp
from jax.experimental import pallas as pl
from jax.experimental.pallas import tpu as pltpu


# ----------------------------------------------------------------------------
# Kernel: grid = (B "parallel", num_chunks "arbitrary" reduction axis).
# Input blocks are (tile_rows, 128) contiguous slabs of one sample (leading
# sample dim squeezed).  The two (8, 128) f32 outputs are resident across the
# chunk axis and act as the accumulators; the per-step reduction is an
# 8-aligned sublane-group sum (pure VPU), so per-step accumulator traffic is
# just 2 x 4 KiB.
# ----------------------------------------------------------------------------
def _dice_partial_kernel(logits_ref, targets_ref, inter_out_ref, denom_out_ref):
    c = pl.program_id(1)

    x = logits_ref[...].astype(jnp.float32)        # (TR, 128)
    t = targets_ref[...].astype(jnp.float32)       # (TR, 128)
    # EUP-friendly sigmoid: exp + approximate reciprocal both land on the EUP.
    p = pl.reciprocal(1.0 + jnp.exp(-x), approx=True)

    ng = x.shape[0] // 8                           # tile_rows is a multiple of 8
    # 8-aligned sublane split -> the group sum is plain cross-vreg VPU adds.
    inter = jnp.sum((p * t).reshape(ng, 8, 128), axis=0)   # (8, 128)
    denom = jnp.sum((p + t).reshape(ng, 8, 128), axis=0)   # (8, 128)

    @pl.when(c == 0)
    def _init():
        inter_out_ref[...] = inter
        denom_out_ref[...] = denom

    @pl.when(c != 0)
    def _acc():
        inter_out_ref[...] += inter
        denom_out_ref[...] += denom


def _default_vmem_sizing():
    """(budget_bytes, limit_bytes) sized per TPU generation."""
    cap = None
    try:
        cap = pltpu.get_tpu_info().vmem_capacity_bytes
    except Exception:
        cap = None
    if cap is not None and cap >= 96 * 1024 * 1024:
        # v5e / v6e: 128 MiB physical VMEM -> large tiles, fewer grid steps.
        return 40 * 1024 * 1024, 96 * 1024 * 1024
    # v7x (64 MiB physical) or unknown hardware: stay conservative.
    return 20 * 1024 * 1024, 48 * 1024 * 1024


def _choose_tile_rows(rows, max_rows):
    """Pick tile_rows (multiple of 8) and the padded row count it divides."""
    rows8 = ((rows + 7) // 8) * 8
    max_rows = max(8, (max_rows // 8) * 8)
    if rows8 <= max_rows:
        return rows8, rows8            # single chunk per sample
    cand = max_rows
    while cand >= 8:
        if rows8 % cand == 0:          # divisor of the (8-aligned) row count
            return cand, rows8
        cand -= 8
    # Unreachable (cand == 8 always divides rows8), kept for safety.
    tile = max_rows
    return tile, ((rows8 + tile - 1) // tile) * tile


def dice_loss(logits, targets, smooth=1.0,
              vmem_budget_bytes=None, vmem_limit_bytes=None):
    """Pallas equivalent of DiceLoss.forward. Returns a scalar float32."""
    auto_budget, auto_limit = _default_vmem_sizing()
    if vmem_budget_bytes is None:
        vmem_budget_bytes = auto_budget
    if vmem_limit_bytes is None:
        vmem_limit_bytes = auto_limit

    B = logits.shape[0]
    lf = jnp.reshape(logits, (B, -1))      # keep original dtype (no HBM cast)
    tf = jnp.reshape(targets, (B, -1))
    N = lf.shape[1]

    lsz = jnp.dtype(lf.dtype).itemsize
    tsz = jnp.dtype(tf.dtype).itemsize

    # Rows of 128 lanes per sample.
    R = (N + 127) // 128

    # VMEM per row of a block: two double-buffered inputs; accumulators are
    # the tiny resident (8,128) outputs and don't scale with tile_rows.
    per_row_bytes = 128 * 2 * (lsz + tsz)
    max_rows = max(8, (vmem_budget_bytes // per_row_bytes) // 8 * 8)

    tile_rows, r_pad = _choose_tile_rows(R, max_rows)
    num_chunks = r_pad // tile_rows

    # Pad (rarely needed): logits with a large negative value -> sigmoid ~ 0,
    # targets with 0 -> padded elements contribute nothing.  -80 keeps
    # exp(-pad) finite in f32 (no reliance on reciprocal(inf)).
    n_total = r_pad * 128
    pad = n_total - N
    if pad:
        if jnp.issubdtype(lf.dtype, jnp.floating):
            neg = -80.0
        else:
            neg = -80
        lf = jnp.pad(lf, ((0, 0), (0, pad)), constant_values=neg)
        tf = jnp.pad(tf, ((0, 0), (0, pad)), constant_values=0)

    lf3 = lf.reshape(B, r_pad, 128)
    tf3 = tf.reshape(B, r_pad, 128)

    cost = pl.CostEstimate(
        flops=4 * B * n_total,
        transcendentals=B * n_total,
        bytes_accessed=int(lf3.size) * lsz + int(tf3.size) * tsz
                       + 2 * B * 8 * 128 * 4,
    )

    inter_part, denom_part = pl.pallas_call(
        _dice_partial_kernel,
        out_shape=(
            jax.ShapeDtypeStruct((B, 8, 128), jnp.float32),
            jax.ShapeDtypeStruct((B, 8, 128), jnp.float32),
        ),
        grid_spec=pltpu.PrefetchScalarGridSpec(
            num_scalar_prefetch=0,
            grid=(B, num_chunks),
            in_specs=[
                pl.BlockSpec((None, tile_rows, 128), lambda b, c: (b, c, 0)),
                pl.BlockSpec((None, tile_rows, 128), lambda b, c: (b, c, 0)),
            ],
            out_specs=[
                pl.BlockSpec((None, 8, 128), lambda b, c: (b, 0, 0)),
                pl.BlockSpec((None, 8, 128), lambda b, c: (b, 0, 0)),
            ],
        ),
        compiler_params=pltpu.CompilerParams(
            dimension_semantics=("parallel", "arbitrary"),
            vmem_limit_bytes=vmem_limit_bytes,
        ),
        cost_estimate=cost,
    )(lf3, tf3)

    # Tiny epilogue in plain JAX: finish the (8,128) reductions + dice + mean.
    inter = jnp.sum(inter_part, axis=(1, 2))     # (B,)
    denom = jnp.sum(denom_part, axis=(1, 2))     # (B,)
    dice = (2.0 * inter + float(smooth)) / (denom + float(smooth))
    return 1.0 - jnp.mean(dice)


def _dice_loss_ref(logits, targets, smooth=1.0):
    B = logits.shape[0]
    p = jax.nn.sigmoid(logits.astype(jnp.float32)).reshape(B, -1)
    t = targets.astype(jnp.float32).reshape(B, -1)
    inter = jnp.sum(p * t, axis=-1)
    dice = (2.0 * inter + smooth) / (jnp.sum(p, -1) + jnp.sum(t, -1) + smooth)
    return 1.0 - jnp.mean(dice)


if __name__ == "__main__":
    key = jax.random.PRNGKey(0)
    k1, k2, k3, k4, k5, k6 = jax.random.split(key, 6)

    # NCHW segmentation logits/targets, as in the module.
    B, C, H, W = 2, 4, 16, 16
    logits = jax.random.normal(k1, (B, C, H, W), dtype=jnp.float32)
    targets = jax.random.bernoulli(k2, 0.5, (B, C, H, W)).astype(jnp.float32)

    loss = jax.block_until_ready(dice_loss(logits, targets, smooth=1.0))
    ref = _dice_loss_ref(logits, targets, smooth=1.0)
    assert jnp.allclose(loss, ref, atol=2e-3, rtol=2e-3), (loss, ref)

    # bf16 inputs streamed natively (no wrapper f32 copy).
    logits_bf = logits.astype(jnp.bfloat16)
    targets_bf = targets.astype(jnp.bfloat16)
    loss_bf = jax.block_until_ready(dice_loss(logits_bf, targets_bf, smooth=1.0))
    ref_bf = _dice_loss_ref(logits_bf, targets_bf, smooth=1.0)
    assert jnp.allclose(loss_bf, ref_bf, atol=5e-3, rtol=5e-3), (loss_bf, ref_bf)

    # Multi-chunk reduction path: a tiny VMEM budget forces tile_rows=8 over
    # R=32 rows per sample -> grid=(2, 4).
    logits2 = jax.random.normal(k3, (2, 4, 32, 32), dtype=jnp.float32)
    targets2 = jax.random.bernoulli(k4, 0.5, (2, 4, 32, 32)).astype(jnp.float32)
    loss2 = jax.block_until_ready(
        dice_loss(logits2, targets2, smooth=1.0, vmem_budget_bytes=1))
    ref2 = _dice_loss_ref(logits2, targets2, smooth=1.0)
    assert jnp.allclose(loss2, ref2, atol=2e-3, rtol=2e-3), (loss2, ref2)

    # Padding path: N = 3*10*10 = 300 is neither a multiple of 128 nor of 8 rows.
    logits3 = jax.random.normal(k5, (2, 3, 10, 10), dtype=jnp.float32)
    targets3 = jax.random.bernoulli(k6, 0.5, (2, 3, 10, 10)).astype(jnp.float32)
    loss3 = jax.block_until_ready(dice_loss(logits3, targets3, smooth=1.0))
    ref3 = _dice_loss_ref(logits3, targets3, smooth=1.0)
    assert jnp.allclose(loss3, ref3, atol=2e-3, rtol=2e-3), (loss3, ref3)

    print("KERNEL_OK")
</pallas_src>

<mosaic_0001>
module attributes {stable_mosaic.version = 11 : i64} {
  func.func @_dice_partial_kernel(%arg0: i32, %arg1: i32, %arg2: memref<1x8x128xf32, #tpu.memory_space<vmem>>, %arg3: memref<1x8x128xf32, #tpu.memory_space<vmem>>, %arg4: memref<1x8x128xf32, #tpu.memory_space<vmem>>, %arg5: memref<1x8x128xf32, #tpu.memory_space<vmem>>) attributes {dimension_semantics = [#tpu.dimension_semantics<parallel>, #tpu.dimension_semantics<arbitrary>], iteration_bounds = array<i64: 2, 1>, scalar_prefetch = 0 : i64, scratch_operands = 0 : i64, tpu.core_type = #tpu.core_type<tc>, window_params = [{transform_indices = @transform_0, window_bounds = array<i64: 1, 8, 128>}, {transform_indices = @transform_1, window_bounds = array<i64: 1, 8, 128>}, {transform_indices = @transform_2, window_bounds = array<i64: 1, 8, 128>}, {transform_indices = @transform_3, window_bounds = array<i64: 1, 8, 128>}]} {
    %c0 = arith.constant 0 : index
    %c0_0 = arith.constant 0 : index
    %c0_1 = arith.constant 0 : index
    %0 = vector.load %arg2[%c0, %c0_0, %c0_1] : memref<1x8x128xf32, #tpu.memory_space<vmem>>, vector<1x8x128xf32>
    %1 = vector.shape_cast %0 : vector<1x8x128xf32> to vector<8x128xf32>
    %c0_2 = arith.constant 0 : index
    %c0_3 = arith.constant 0 : index
    %c0_4 = arith.constant 0 : index
    %2 = vector.load %arg3[%c0_2, %c0_3, %c0_4] : memref<1x8x128xf32, #tpu.memory_space<vmem>>, vector<1x8x128xf32>
    %3 = vector.shape_cast %2 : vector<1x8x128xf32> to vector<8x128xf32>
    %cst = arith.constant 0.000000e+00 : f32
    %4 = vector.broadcast %cst : f32 to vector<8x128xf32>
    %5 = arith.subf %4, %1 : vector<8x128xf32>
    %6 = math.exp %5 : vector<8x128xf32>
    %cst_5 = arith.constant 1.000000e+00 : f32
    %7 = vector.broadcast %cst_5 : f32 to vector<8x128xf32>
    %8 = arith.addf %7, %6 : vector<8x128xf32>
    %9 = tpu.reciprocal %8 {approx = true} : vector<8x128xf32> -> vector<8x128xf32>
    %10 = arith.mulf %9, %3 : vector<8x128xf32>
    %11 = vector.shape_cast %10 : vector<8x128xf32> to vector<1x8x128xf32>
    %cst_6 = arith.constant dense<0.000000e+00> : vector<8x128xf32>
    %12 = vector.multi_reduction <add>, %11, %cst_6 [0] : vector<1x8x128xf32> to vector<8x128xf32>
    %13 = arith.addf %9, %3 : vector<8x128xf32>
    %14 = vector.shape_cast %13 : vector<8x128xf32> to vector<1x8x128xf32>
    %cst_7 = arith.constant dense<0.000000e+00> : vector<8x128xf32>
    %15 = vector.multi_reduction <add>, %14, %cst_7 [0] : vector<1x8x128xf32> to vector<8x128xf32>
    %c0_i32 = arith.constant 0 : i32
    %16 = arith.cmpi eq, %arg1, %c0_i32 : i32
    %17 = arith.extui %16 : i1 to i32
    %c0_i32_8 = arith.constant 0 : i32
    %18 = arith.cmpi ne, %17, %c0_i32_8 : i32
    scf.if %18 {
      %c0_11 = arith.constant 0 : index
      %c0_12 = arith.constant 0 : index
      %c0_13 = arith.constant 0 : index
      %22 = vector.load %arg4[%c0_11, %c0_12, %c0_13] : memref<1x8x128xf32, #tpu.memory_space<vmem>>, vector<1x8x128xf32>
      %23 = vector.shape_cast %22 : vector<1x8x128xf32> to vector<8x128xf32>
      %24 = vector.shape_cast %12 : vector<8x128xf32> to vector<1x8x128xf32>
      tpu.vector_store %arg4[%c0_11, %c0_12, %c0_13], %24 {strides = array<i32>} : memref<1x8x128xf32, #tpu.memory_space<vmem>>, vector<1x8x128xf32>,
      %c0_14 = arith.constant 0 : index
      %c0_15 = arith.constant 0 : index
      %c0_16 = arith.constant 0 : index
      %25 = vector.load %arg5[%c0_14, %c0_15, %c0_16] : memref<1x8x128xf32, #tpu.memory_space<vmem>>, vector<1x8x128xf32>
      %26 = vector.shape_cast %25 : vector<1x8x128xf32> to vector<8x128xf32>
      %27 = vector.shape_cast %15 : vector<8x128xf32> to vector<1x8x128xf32>
      tpu.vector_store %arg5[%c0_14, %c0_15, %c0_16], %27 {strides = array<i32>} : memref<1x8x128xf32, #tpu.memory_space<vmem>>, vector<1x8x128xf32>,
    } else {
    }
    %c0_i32_9 = arith.constant 0 : i32
    %19 = arith.cmpi ne, %arg1, %c0_i32_9 : i32
    %20 = arith.extui %19 : i1 to i32
    %c0_i32_10 = arith.constant 0 : i32
    %21 = arith.cmpi ne, %20, %c0_i32_10 : i32
    scf.if %21 {
      %c0_11 = arith.constant 0 : index
      %c0_12 = arith.constant 0 : index
      %c0_13 = arith.constant 0 : index
      %22 = vector.load %arg4[%c0_11, %c0_12, %c0_13] : memref<1x8x128xf32, #tpu.memory_space<vmem>>, vector<1x8x128xf32>
      %23 = vector.shape_cast %22 : vector<1x8x128xf32> to vector<8x128xf32>
      %24 = arith.addf %23, %12 : vector<8x128xf32>
      %c0_14 = arith.constant 0 : index
      %c0_15 = arith.constant 0 : index
      %c0_16 = arith.constant 0 : index
      %25 = vector.load %arg4[%c0_14, %c0_15, %c0_16] : memref<1x8x128xf32, #tpu.memory_space<vmem>>, vector<1x8x128xf32>
      %26 = vector.shape_cast %25 : vector<1x8x128xf32> to vector<8x128xf32>
      %27 = vector.shape_cast %24 : vector<8x128xf32> to vector<1x8x128xf32>
      tpu.vector_store %arg4[%c0_14, %c0_15, %c0_16], %27 {strides = array<i32>} : memref<1x8x128xf32, #tpu.memory_space<vmem>>, vector<1x8x128xf32>,
      %c0_17 = arith.constant 0 : index
      %c0_18 = arith.constant 0 : index
      %c0_19 = arith.constant 0 : index
      %28 = vector.load %arg5[%c0_17, %c0_18, %c0_19] : memref<1x8x128xf32, #tpu.memory_space<vmem>>, vector<1x8x128xf32>
      %29 = vector.shape_cast %28 : vector<1x8x128xf32> to vector<8x128xf32>
      %30 = arith.addf %29, %15 : vector<8x128xf32>
      %c0_20 = arith.constant 0 : index
      %c0_21 = arith.constant 0 : index
      %c0_22 = arith.constant 0 : index
      %31 = vector.load %arg5[%c0_20, %c0_21, %c0_22] : memref<1x8x128xf32, #tpu.memory_space<vmem>>, vector<1x8x128xf32>
      %32 = vector.shape_cast %31 : vector<1x8x128xf32> to vector<8x128xf32>
      %33 = vector.shape_cast %30 : vector<8x128xf32> to vector<1x8x128xf32>
      tpu.vector_store %arg5[%c0_20, %c0_21, %c0_22], %33 {strides = array<i32>} : memref<1x8x128xf32, #tpu.memory_space<vmem>>, vector<1x8x128xf32>,
    } else {
    }
    return
  }
  func.func @transform_0(%arg0: i32, %arg1: i32) -> (i32, i32, i32) {
    %c0_i32 = arith.constant 0 : i32
    %c0_i32_0 = arith.constant 0 : i32
    return %arg0, %arg1, %c0_i32 : i32, i32, i32
  }
  func.func @transform_1(%arg0: i32, %arg1: i32) -> (i32, i32, i32) {
    %c0_i32 = arith.constant 0 : i32
    %c0_i32_0 = arith.constant 0 : i32
    return %arg0, %arg1, %c0_i32 : i32, i32, i32
  }
  func.func @transform_2(%arg0: i32, %arg1: i32) -> (i32, i32, i32) {
    %c0_i32 = arith.constant 0 : i32
    %c0_i32_0 = arith.constant 0 : i32
    %c0_i32_1 = arith.constant 0 : i32
    return %arg0, %c0_i32, %c0_i32_0 : i32, i32, i32
  }
  func.func @transform_3(%arg0: i32, %arg1: i32) -> (i32, i32, i32) {
    %c0_i32 = arith.constant 0 : i32
    %c0_i32_0 = arith.constant 0 : i32
    %c0_i32_1 = arith.constant 0 : i32
    return %arg0, %c0_i32, %c0_i32_0 : i32, i32, i32
  }
}

</mosaic_0001>

<bundles_post_ra>
// kernel: tpu_custom_call.1
= control target key start
LH: loop header
LB: loop body
LE: loop exit
PB: predicated region body
PF: predicated region fallthrough
CT: control target
= control target key end

     0   :  { %9 = vsyncpa [#allocation3], 0  ;;  %s1000_s0 = inlined_call_operand.hbm [shape: f32[2,8,128], index: 0, kind: input, shape index: {}]   ;;  %s1001_s1 = inlined_call_operand.hbm [shape: f32[2,8,128], index: 1, kind: input, shape index: {}]   ;;  %s1002_s2 = inlined_call_operand.hbm [shape: f32[2,8,128], index: 2, kind: output, shape index: {0}]   ;;  %s1003_s3 = inlined_call_operand.hbm [shape: f32[2,8,128], index: 3, kind: output, shape index: {1}]  }
   0x1   :  { %11 = vsyncpa [#allocation3 + $0x1], 0 }
   0x2   :  { %12 = vsyncpa [#allocation6], 0 }
   0x3   :  { %14 = vsyncpa [#allocation6 + $0x1], 0 }
   0x4   :  { %15 = vsyncpa [#allocation4], 0 }
   0x5   :  { %17 = vsyncpa [#allocation4 + $0x1], 0 }
   0x6   :  { %18 = vsyncpa [#allocation9], 0 }
   0x7   :  { %20 = vsyncpa [#allocation9 + $0x1], 0  ;;  %s745_s12 = smov 0   ;;  %s747_s13 = smov 0  }
   0x8   :  { %s749_s14 = smov 0   ;;  %s751_s15 = smov 0  }
   0x9   :  { %s753_s16 = smov 0   ;;  %s755_s17 = smov 0  }
   0xa LB: > { %s446_s18 = sadd.s32 4294967295, %s719_s17   ;;  %s447_s19 = sadd.s32 4294967294, %s719_s17   ;;  %s719_s17 = sphi %s755_s17, %s26_s17   ;;  %s715_s16 = sphi %s753_s16, %s1023_s16   ;;  %s711_s15 = sphi %s751_s15, %s1022_s15   ;;  %s707_s14 = sphi %s749_s14, %s1021_s14   ;;  %s703_s13 = sphi %s747_s13, %s1020_s13   ;;  %s699_s12 = sphi %s745_s12, %s1019_s12  }
   0xb   : > { %s38_s20 = sadd.s32 1, %s715_s16  ;;  %s47_s21 = sadd.s32 1, %s707_s14 }
   0xc   : > { %p40_p0 = scmp.ge.s32.totalorder %s38_s20, 2  ;;  %p54_p1 = scmp.ne.s32.totalorder %s707_s14, %s703_s13 }
   0xd   : > { %p55_p2 = scmp.eq.s32.totalorder %s719_s17, 0  ;;  %p60_p3 = scmp.ne.s32.totalorder %s703_s13, %s699_s12 }
   0xe   : > { %s1025_s20 = smov (%p40_p0, %s38_s20), 0  ;;  %p61_p5 = scmp.eq.s32.totalorder %s446_s18, 0 }
   0xf   : > { %p786_p4 = por %p55_p2, %p54_p1  ;;  %s42_s23 = ssub.s32 %s715_s16, %s1025_s20 }
  0x10   : > { %p112_p6 = scmp.eq.s32.totalorder %s446_s18, 1  ;;  %p45_p7 = scmp.eq.s32.totalorder %s42_s23, 0 }
  0x11   : > { %p792_p8 = por %p61_p5, %p60_p3  ;;  %p118_p10 = scmp.eq.s32.totalorder %s447_s19, 1 }
  0x12   : > { %p796_p9 = por %p112_p6, %p54_p1  ;;  %p487_p13 = scmp.lt.s32.totalorder %s719_s17, 2 }
  0x13   : > { %s1007_s24 = scalar_select %p792_p8, 1, 0 }
  0x14   : > { %s1008_s25 = scalar_select %p796_p9, 1, 0 }
  0x15   : > { %s801_s26 = scalar_select %p45_p7, %s707_s14, %s47_s21  }
  0x16   : > { %p803_p11 = por %p118_p10, %p60_p3  ;;  %s810_s28 = sand.u32 1, %s707_s14  }
  0x17   : > { %s450_s29 = sshll.u32 %s810_s28, 3  ;;  %s451_s30 = sshll.u32 %s715_s16, 7 }
  0x18   : > { %s1009_s27 = scalar_select %p803_p11, 1, 0 }
  0x19   : > { %s819_s6 = scalar_lea.hbm %s1000_s0, %s451_s30  ;;  %s168_s7 = scalar_lea.vmem [#allocation2], %s450_s29 }
  0x1a   : > { %s176_s8 = sshll.u32 %s168_s7, 4  ;;  %p827_p0 = pnand %p487_p13, %p786_p4  ;;  %s823_s8 = int_to_ptr.vmem [resolvable:$true] %s176_s8 }
  0x1b   : > { %s165_s10 = scalar_lea.sflag [#allocation3], %s810_s28  ;;  %s541_s11 = scalar_lea.hbm %s819_s6, 128 }
  0x1c   : > { %p542_p3 = scmp.ne.s32.totalorder %s819_s6, %s541_s11  ;;  %p543_p5 = pneg %p827_p0 }
  0x1d   : > { %s546_s21 = scalar_lea.hbm %s1000_s0, 256  ;;  %p547_p4 = scmp.lt.u32.totalorder %s819_s6, %s1000_s0 }
  0x1e   : > { %p544_p6 = pnand %p543_p5, %p542_p3  ;;  %p548_p10 = scmp.lt.u32.totalorder %s546_s21, %s541_s11 }
  0x1f   : > { %p550_p12 = scmp.lt.u32.totalorder %s541_s11, %s819_s6 }
  0x20   : > { %p545_p7 = pneg %p544_p6  ;;  %p549_p13 = por %p548_p10, %p547_p4 }
  0x22   : > { %p551_p1 = por %p550_p12, %p549_p13 }
  0x24   : > { %p552_p2 = pnand %p551_p1, %p545_p7 }
  0x26   : > { %555 = shalt.err (!%p552_p2)
}
  0x27   : > { %s556_s4 = scalar_lea.vmem %s823_s8, 128  ;;  %s721_s5 = smov [#allocation2]  }
  0x28   : > { %p557_p3 = scmp.ne.s32.totalorder %s823_s8, %s556_s4  ;;  %s561_s7 = sshll.u32 %s721_s5, 4  ;;  %s562_s7 = int_to_ptr.vmem [resolvable:$false] %s561_s7 }
  0x29   : > { %s563_s18 = scalar_lea.vmem %s562_s7, 256  ;;  %p564_p9 = scmp.lt.s32.totalorder %s823_s8, %s562_s7 }
  0x2a   : > { %p559_p6 = pnand %p557_p3, %p543_p5  ;;  %p565_p4 = scmp.lt.s32.totalorder %s563_s18, %s556_s4 }
  0x2c   : > { %p560_p11 = pneg %p559_p6  ;;  %p566_p10 = por %p565_p4, %p564_p9 }
  0x2e   : > { %p567_p12 = pnand %p566_p10, %p560_p11 }
  0x30   : > { %570 = shalt.err (!%p567_p12)
}
  0x31   : > { %476 = dma.hbm_to_vmem [thread:$0]  (!%p827_p0), %s819_s6, 128, %s823_s8, %s165_s10  }
  0x32   : > { %p1011_p1 = scmp.lt.s32.totalorder %s719_s17, 3  ;;  %p1012_p2 = scmp.ge.s32.totalorder %s719_s17, 1 }
  0x33   : > { %s872_s22 = scalar_lea.hbm %s1001_s1, %s451_s30  ;;  %s187_s23 = scalar_lea.vmem [#allocation5], %s450_s29 }
  0x34   : > { %p863_p7 = pnand %p1012_p2, %p1011_p1  ;;  %s195_s4 = sshll.u32 %s187_s23, 4  ;;  %s196_s4 = int_to_ptr.vmem [resolvable:$true] %s195_s4 }
  0x35   : > { %s184_s6 = scalar_lea.sflag [#allocation6], %s810_s28  ;;  %s571_s8 = scalar_lea.hbm %s872_s22, 128 }
  0x36   : > { %s1013_s11 = scalar_select %p863_p7, 1, 0 }
  0x37   : > { %p572_p9 = scmp.ne.s32.totalorder %s872_s22, %s571_s8  ;;  %s576_s30 = scalar_lea.hbm %s1001_s1, 256 }
  0x38   : > { %p577_p3 = scmp.lt.u32.totalorder %s872_s22, %s1001_s1  ;;  %p578_p6 = scmp.lt.u32.totalorder %s576_s30, %s571_s8 }
  0x39   : > { %p574_p11 = pnand %p572_p9, %p543_p5  ;;  %p580_p10 = scmp.lt.u32.totalorder %s571_s8, %s872_s22 }
  0x3a   : > { %p579_p4 = por %p578_p6, %p577_p3 }
  0x3b   : > { %p575_p13 = pneg %p574_p11 }
  0x3c   : > { %p581_p12 = por %p580_p10, %p579_p4 }
  0x3e   : > { %p582_p1 = pnand %p581_p12, %p575_p13 }
  0x40   : > { %585 = shalt.err (!%p582_p1)
}
  0x41   : > { %s586_s28 = scalar_lea.vmem %s196_s4, 128  ;;  %s722_s29 = smov [#allocation5]  }
  0x42   : > { %p587_p2 = scmp.ne.s32.totalorder %s196_s4, %s586_s28  ;;  %s591_s19 = sshll.u32 %s722_s29, 4  ;;  %s592_s19 = int_to_ptr.vmem [resolvable:$false] %s591_s19 }
  0x43   : > { %s593_s21 = scalar_lea.vmem %s592_s19, 256  ;;  %p594_p8 = scmp.lt.s32.totalorder %s196_s4, %s592_s19 }
  0x44   : > { %p589_p9 = pnand %p587_p2, %p543_p5  ;;  %p595_p7 = scmp.lt.s32.totalorder %s593_s21, %s586_s28 }
  0x46   : > { %p590_p11 = pneg %p589_p9  ;;  %p596_p3 = por %p595_p7, %p594_p8 }
  0x48   : > { %p597_p6 = pnand %p596_p3, %p590_p11 }
  0x4a   : > { %600 = shalt.err (!%p597_p6)
}
  0x4b   : > { %479 = dma.hbm_to_vmem [thread:$0]  (!%p827_p0), %s872_s22, 128, %s196_s4, %s184_s6  }
  0x4c   : > { %p1014_p13 = scmp.ne.s32.totalorder %s1013_s11, 0 }
  0x4d   : > { %s899_s23 = sand.u32 (!%p1014_p13), 1, %s703_s13   ;;  %p1015_p8 = scmp.ne.s32.totalorder (!%p1014_p13), %s1007_s24, 0 }
  0x4e   : > { %204 = sbr.rel (%p1014_p13) target bundleno = 156 (0x9c), region = 28  ;;  %s902_s8 = sshll.u32 (!%p1014_p13), %s899_s23, 3 }
  0x4f   : > { %s207_s10 = scalar_lea.sflag (!%p1014_p13), [#allocation3], %s899_s23  ;;  %s210_s5 = scalar_lea.vmem (!%p1014_p13), [#allocation2], %s902_s8 }
  0x55   : > { %682 = dma.done.wait (%p1015_p8), %s207_s10, 128  }
  0x56   : > { %684 = vsyncadd (%p1015_p8), %s207_s10, 4294967168  ;;  %s216_s9 = scalar_lea.sflag [#allocation6], %s899_s23  ;;  %s219_s11 = scalar_lea.vmem [#allocation5], %s902_s8 }
  0x57   : > { %686 = dma.done.wait (%p1015_p8), %s216_s9, 128  }
  0x58   : > { %688 = vsyncadd (%p1015_p8), %s216_s9, 4294967168  ;;  %v252_v0 = vld [vmem:[%s210_s5] sm:$0xff]  ;;  %s244_s22 = scalar_lea.vmem [#allocation7], %s902_s8  ;;  %s251_s6 = scalar_lea.vmem [#allocation8], %s902_s8  ;;  %v253_v5 = vld [vmem:[%s219_s11] sm:$0xff] }
  0x59   : > { %v254_v1 = vsub.f32 0.0, %v252_v0  ;;  %s298_s4 = sshll.u32 %s244_s22, 4  ;;  %s311_s30 = sshll.u32 %s251_s6, 4  ;;  %s919_s4 = int_to_ptr.vmem [resolvable:$true] %s298_s4  ;;  %s921_s30 = int_to_ptr.vmem [resolvable:$true] %s311_s30 }
  0x5a   : > { %s461_s7 = sshll.u32 %s711_s15, 7  ;;  %s280_s15 = scalar_lea.sflag [#allocation4], %s899_s23 }
  0x5b   : > { %v255_v2 = vmul.f32 1.442695, %v254_v1  ;;  %s926_s28 = scalar_lea.hbm %s1002_s2, %s461_s7  ;;  %s931_s21 = scalar_lea.hbm %s1003_s3, %s461_s7 }
  0x5c   : > { %s601_s8 = scalar_lea.vmem %s919_s4, 128  ;;  %p1016_p5 = scmp.ne.s32.totalorder %s1008_s25, 0 }
  0x5d   : > { %537 = vpow2.f32 %v255_v2  ;;  %p602_p0 = scmp.ne.s32.totalorder %s919_s4, %s601_s8  ;;  %s723_s10 = smov [#allocation7]  }
  0x5e   : > { %s605_s5 = sshll.u32 %s723_s10, 4  ;;  %s606_s5 = int_to_ptr.vmem [resolvable:$false] %s605_s5 }
  0x5f   : > { %p603_p7 = pnand %p602_p0, %p1016_p5  ;;  %s607_s9 = scalar_lea.vmem %s606_s5, 256 }
  0x60   : > { %p608_p10 = scmp.lt.s32.totalorder %s919_s4, %s606_s5  ;;  %p609_p12 = scmp.lt.s32.totalorder %s607_s9, %s601_s8 }
  0x61   : > { %p604_p4 = pneg %p603_p7 }
  0x62   : > { %p610_p1 = por %p609_p12, %p608_p10 }
  0x64   : > { %p611_p2 = pnand %p610_p1, %p604_p4 }
  0x67   : > { %v538_v3 = vpop.eup %537 }
  0x68   : > { %v257_v4 = vadd.f32 1.0, %v538_v3 }
  0x6a   : > { %539 = vrcp.f32 %v257_v4 }
  0x74   : > { %v540_v6 = vpop.eup %539 }
  0x75   : > { %v259_v7 = vmul.f32 %v540_v6, %v253_v5  ;;  %v261_v8 = vadd.f32 %v540_v6, %v253_v5 }
  0x77   : > { %267 = vst [vmem:[%s244_s22] sm:$0xff] %v259_v7  ;;  %268 = vst [vmem:[%s251_s6] sm:$0xff] %v261_v8 }
  0x78   : > { %614 = shalt.err (!%p611_p2)
}
  0x79   : > { %s615_s11 = scalar_lea.hbm %s926_s28, 128  ;;  %s619_s7 = scalar_lea.hbm %s1002_s2, 256 }
  0x7a   : > { %p616_p9 = scmp.ne.s32.totalorder %s926_s28, %s615_s11  ;;  %p620_p6 = scmp.lt.u32.totalorder %s926_s28, %s1002_s2 }
  0x7b   : > { %p621_p13 = scmp.lt.u32.totalorder %s619_s7, %s615_s11  ;;  %p623_p0 = scmp.lt.u32.totalorder %s615_s11, %s926_s28 }
  0x7c   : > { %p617_p11 = pnand %p616_p9, %p1016_p5 }
  0x7d   : > { %p622_p8 = por %p621_p13, %p620_p6 }
  0x7e   : > { %p618_p3 = pneg %p617_p11 }
  0x7f   : > { %p624_p7 = por %p623_p0, %p622_p8 }
  0x81   : > { %p625_p4 = pnand %p624_p7, %p618_p3 }
  0x83   : > { %628 = shalt.err (!%p625_p4)
}
  0x84   : > { %469 = dma.vmem_to_hbm [thread:$0]  (%p1016_p5), %s919_s4, 128, %s926_s28, %s280_s15  }
  0x85   : > { %s285_s29 = scalar_lea.sflag [#allocation9], %s899_s23  ;;  %s629_s19 = scalar_lea.vmem %s921_s30, 128 }
  0x86   : > { %p630_p10 = scmp.ne.s32.totalorder %s921_s30, %s629_s19  ;;  %s724_s8 = smov [#allocation8]  }
  0x87   : > { %s633_s10 = sshll.u32 %s724_s8, 4  ;;  %s634_s10 = int_to_ptr.vmem [resolvable:$false] %s633_s10 }
  0x88   : > { %p631_p12 = pnand %p630_p10, %p1016_p5  ;;  %s635_s5 = scalar_lea.vmem %s634_s10, 256 }
  0x89   : > { %p636_p2 = scmp.lt.s32.totalorder %s921_s30, %s634_s10  ;;  %p637_p9 = scmp.lt.s32.totalorder %s635_s5, %s629_s19 }
  0x8a   : > { %p632_p1 = pneg %p631_p12 }
  0x8b   : > { %p638_p11 = por %p637_p9, %p636_p2 }
  0x8d   : > { %p639_p3 = pnand %p638_p11, %p632_p1 }
  0x8f   : > { %642 = shalt.err (!%p639_p3)
}
  0x90   : > { %s643_s23 = scalar_lea.hbm %s931_s21, 128  ;;  %s647_s15 = scalar_lea.hbm %s1003_s3, 256 }
  0x91   : > { %p644_p6 = scmp.ne.s32.totalorder %s931_s21, %s643_s23  ;;  %p648_p0 = scmp.lt.u32.totalorder %s931_s21, %s1003_s3 }
  0x92   : > { %p649_p7 = scmp.lt.u32.totalorder %s647_s15, %s643_s23  ;;  %p651_p10 = scmp.lt.u32.totalorder %s643_s23, %s931_s21 }
  0x93   : > { %p645_p13 = pnand %p644_p6, %p1016_p5 }
  0x94   : > { %p650_p4 = por %p649_p7, %p648_p0 }
  0x95   : > { %p646_p8 = pneg %p645_p13 }
  0x96   : > { %p652_p12 = por %p651_p10, %p650_p4 }
  0x98   : > { %p653_p1 = pnand %p652_p12, %p646_p8 }
  0x9a   : > { %656 = shalt.err (!%p653_p1)
}
  0x9b   : > { %470 = dma.vmem_to_hbm [thread:$0]  (%p1016_p5), %s921_s30, 128, %s931_s21, %s285_s29  }
  0x9c PF: > { %s323_s22 = sand.u32 1, %s699_s12   ;;  %p1017_p2 = scmp.ne.s32.totalorder %s1009_s27, 0 }
  0x9d   : > { %p1018_p9 = scmp.ge.s32.totalorder %s719_s17, 2  ;;  %s324_s6 = scalar_lea.sflag [#allocation4], %s323_s22 }
  0x9f   : > { %p481_p11 = pnand %p1018_p9, %p1017_p2 }
  0xa1   : > { %690 = dma.done.wait (!%p481_p11), %s324_s6, 128  }
  0xa2   : > { %692 = vsyncadd (!%p481_p11), %s324_s6, 4294967168  ;;  %s333_s7 = scalar_lea.sflag [#allocation9], %s323_s22 }
  0xa3   : > { %694 = dma.done.wait (!%p481_p11), %s333_s7, 128  }
  0xa4   : > { %696 = vsyncadd (!%p481_p11), %s333_s7, 4294967168  ;;  %s26_s17 = sadd.s32 1, %s719_s17   ;;  %s1019_s12 = smov %s703_s13 }
  0xa5   : > { %p23_p3 = scmp.ge.s32.totalorder %s26_s17, 4   ;;  %s1020_s13 = smov %s707_s14 }
  0xa6   : > { %s1021_s14 = smov %s801_s26  ;;  %s1022_s15 = smov %s715_s16 }
  0xa7   : > { %s1023_s16 = smov %s1025_s20  ;;  %25 = sbr.rel (!%p23_p3) target bundleno = 10 (0xa), region = 111 }
  0xae   :  { %338 = vsyncpa [#allocation3], 1 }
  0xaf   :  { %340 = vsyncpa [#allocation3 + $0x1], 1 }
  0xb0   :  { %341 = vsyncpa [#allocation6], 1 }
  0xb1   :  { %343 = vsyncpa [#allocation6 + $0x1], 1 }
  0xb2   :  { %344 = vsyncpa [#allocation4], 1 }
  0xb3   :  { %346 = vsyncpa [#allocation4 + $0x1], 1 }
  0xb4   :  { %347 = vsyncpa [#allocation9], 1 }
  0xb5   :  { %349 = vsyncpa [#allocation9 + $0x1], 1 }

</bundles_post_ra>
